<compile_context>
chip_gen: v7x
topology: tpu7x:2x2x1
jax: 0.10.0
libtpu: 0.0.40
codegen_flags: <defaults>
</compile_context>

<pallas_src>
import functools

import numpy as np
import jax
import jax.numpy as jnp
from jax.experimental import pallas as pl
from jax.experimental.pallas import tpu as pltpu


# --------------------------------------------------------------------------------------
# Static band matrix: row t holds the AvgPool1d(K, stride=1) weights over the
# replicate-padded series, i.e.  trend = A @ series  (padding folded into the weights).
# --------------------------------------------------------------------------------------
def _trend_band_matrix(length, kernel_size):
    pad = (kernel_size - 1) // 2
    t = np.arange(length)[:, None]                       # (length, 1)
    k = np.arange(kernel_size)[None, :]                  # (1, K)
    src = np.clip(t + k - pad, 0, length - 1)            # (length, K) source indices
    a = np.zeros((length, length), dtype=np.float64)
    np.add.at(a, (np.broadcast_to(t, src.shape), src), 1.0)
    return (a / kernel_size).astype(np.float32)


# --------------------------------------------------------------------------------------
# Fused kernel: CI Linear (+bias) + in-kernel trends + instance-norm stats/denorm
#               + masked per-tile MSE partial sum.   Grid: lane tiles of N = B*C.
# --------------------------------------------------------------------------------------
def _fused_kernel(*refs, part, n_valid):
    if part == 't':
        xa_ref, xp_ref, wa_ref, ax_ref, ap_ref, y_ref, loss_ref = refs
    else:
        xa_ref, xp_ref, wa_ref, ap_ref, y_ref, loss_ref = refs

    t = pl.program_id(0)
    tn = y_ref.shape[-1]

    xa = xa_ref[...]                                   # (L+1, TN): raw x + ones row
    xp = xp_ref[...]                                   # (P,   TN): raw x_pred

    # Channel-independent Linear over time, bias folded into the last column of Wa.
    y = jnp.dot(wa_ref[...], xa, preferred_element_type=jnp.float32)        # (P, TN)

    # Label: moving-average trend (or residual) of x_pred via band-matrix matmul.
    trend_p = jnp.dot(ap_ref[...], xp, preferred_element_type=jnp.float32)  # (P, TN)
    label = trend_p if part == 't' else xp - trend_p

    if part == 't':
        # Trend of x (for instance-norm stats), also on the MXU: x_t = Ax @ x.
        xt = jnp.dot(ax_ref[...], xa, preferred_element_type=jnp.float32)   # (L, TN)
        means = jnp.mean(xt, axis=0, keepdims=True)                         # (1, TN)
        var = jnp.mean((xt - means) ** 2, axis=0, keepdims=True)            # pop-var
        stdev = jnp.sqrt(var + 1e-5)
        y = y * stdev + means                                               # denorm

    y_ref[...] = y

    # Masked per-tile MSE partial sum (zero-padded lane columns excluded).
    col = t * tn + jax.lax.broadcasted_iota(jnp.int32, (1, tn), 1)
    diff2 = jnp.where(col < n_valid, (y - label) ** 2, 0.0)
    loss_ref[0] = jnp.sum(diff2, keepdims=True)


@functools.partial(jax.jit, static_argnames=("window_size", "part", "CI"))
def decomp_linear_forward(x, x_pred, weight, bias, *, window_size, part='t', CI=True):
    """Returns (loss, y) exactly like decomp_Linear.forward.

    CI=True / CI=False are mathematically identical here (the Linear weights are shared
    across channels); the kernel computes the per-channel matmul directly.
    """
    assert window_size % 2 == 1, "series_decomp replicate padding requires odd window_size"
    x = x.astype(jnp.float32)
    x_pred = x_pred.astype(jnp.float32)
    B, L, C = x.shape
    P = weight.shape[0]
    N = B * C

    # Lane-dense layout: columns are (batch, channel) pairs; lane tile multiple of 128,
    # sized against a ~24 MiB VMEM budget (double-buffered slabs + output + temps).
    per_lane_bytes = 4 * (2 * (L + 1) + (L if part == 't' else 0) + 6 * P)
    tn_cap = max(128, min(1024, ((24 << 20) // max(per_lane_bytes, 1)) // 128 * 128))
    TN = max(128, min(tn_cap, ((N + 127) // 128) * 128))
    num_tiles = -(-N // TN)
    Npad = num_tiles * TN

    x_lan = jnp.transpose(x, (1, 0, 2)).reshape(L, N)                 # (L, N)
    xp_lan = jnp.transpose(x_pred, (1, 0, 2)).reshape(P, N)           # (P, N)
    xa = jnp.concatenate([x_lan, jnp.ones((1, N), jnp.float32)], 0)   # ones row -> bias
    if Npad > N:
        xa = jnp.pad(xa, ((0, 0), (0, Npad - N)))
        xp_lan = jnp.pad(xp_lan, ((0, 0), (0, Npad - N)))

    w_aug = jnp.concatenate([weight.astype(jnp.float32),
                             bias.reshape(P, 1).astype(jnp.float32)], axis=1)  # (P, L+1)
    a_p = jnp.asarray(_trend_band_matrix(P, window_size))                      # (P, P)

    operands = [xa, xp_lan, w_aug]
    in_specs = [
        pl.BlockSpec((L + 1, TN), lambda t: (0, t)),       # x slab (lane tile)
        pl.BlockSpec((P, TN), lambda t: (0, t)),           # x_pred slab (lane tile)
        pl.BlockSpec((P, L + 1), lambda t: (0, 0)),        # [W | bias]   (resident)
    ]
    if part == 't':
        a_x = jnp.concatenate([jnp.asarray(_trend_band_matrix(L, window_size)),
                               jnp.zeros((L, 1), jnp.float32)], axis=1)        # (L, L+1)
        operands.append(a_x)
        in_specs.append(pl.BlockSpec((L, L + 1), lambda t: (0, 0)))  # x trend band (resident)
    operands.append(a_p)
    in_specs.append(pl.BlockSpec((P, P), lambda t: (0, 0)))          # x_pred trend band

    kern = functools.partial(_fused_kernel, part=part, n_valid=N)
    y_lan, loss_parts = pl.pallas_call(
        kern,
        out_shape=(jax.ShapeDtypeStruct((P, Npad), jnp.float32),
                   jax.ShapeDtypeStruct((num_tiles, 1, 1), jnp.float32)),
        grid_spec=pltpu.PrefetchScalarGridSpec(
            num_scalar_prefetch=0,
            grid=(num_tiles,),
            in_specs=in_specs,
            out_specs=(pl.BlockSpec((P, TN), lambda t: (0, t)),
                       pl.BlockSpec((1, 1, 1), lambda t: (t, 0, 0))),
        ),
        compiler_params=pltpu.CompilerParams(dimension_semantics=("parallel",)),
    )(*operands)

    loss = jnp.sum(loss_parts) / (B * P * C)
    y = y_lan[:, :N].reshape(P, B, C).transpose(1, 0, 2)               # (B, P, C)
    return loss, y


# --------------------------------------------------------------------------------------
# Pure-JAX reference (mirrors the PyTorch forward) for a correctness check.
# --------------------------------------------------------------------------------------
def _reference_forward(x, x_pred, weight, bias, window_size, part='t'):
    def trend(z):
        pad = (window_size - 1) // 2
        zp = jnp.concatenate(
            [jnp.repeat(z[:, :1], pad, 1), z, jnp.repeat(z[:, -1:], pad, 1)], axis=1)
        cols = [zp[:, t:t + window_size].mean(axis=1) for t in range(z.shape[1])]
        return jnp.stack(cols, axis=1)

    x_t = trend(x)
    x_t_pred = trend(x_pred)
    label = x_t_pred if part == 't' else (x_pred - x_t_pred)
    means = x_t.mean(axis=1, keepdims=True)
    stdev = jnp.sqrt(((x_t - means) ** 2).mean(axis=1, keepdims=True) + 1e-5)
    y = jnp.einsum('blc,pl->bpc', x, weight) + bias[None, :, None]
    if part == 't':
        y = y * stdev + means
    return jnp.mean((y - label) ** 2), y


if __name__ == "__main__":
    B, C, L, P, K = 2, 4, 16, 8, 5   # batch, c_in, input_len, pred_len, window_size (odd)

    key = jax.random.PRNGKey(0)
    kx, kp, kw, kb = jax.random.split(key, 4)
    x = jax.random.normal(kx, (B, L, C), dtype=jnp.float32)
    x_pred = jax.random.normal(kp, (B, P, C), dtype=jnp.float32)
    # Deterministic nn.Linear-style init: U(-1/sqrt(in), 1/sqrt(in))
    bound = 1.0 / (L ** 0.5)
    weight = jax.random.uniform(kw, (P, L), minval=-bound, maxval=bound, dtype=jnp.float32)
    bias = jax.random.uniform(kb, (P,), minval=-bound, maxval=bound, dtype=jnp.float32)

    for part in ('t', 's'):
        loss, y = decomp_linear_forward(x, x_pred, weight, bias,
                                        window_size=K, part=part, CI=True)
        jax.block_until_ready((loss, y))
        ref_loss, ref_y = _reference_forward(x, x_pred, weight, bias, K, part=part)
        assert jnp.allclose(y, ref_y, atol=1e-4, rtol=1e-4), f"output mismatch (part={part})"
        assert jnp.allclose(loss, ref_loss, atol=1e-4, rtol=1e-4), f"loss mismatch (part={part})"

    print("KERNEL_OK")
</pallas_src>

<mosaic_0001>
module attributes {stable_mosaic.version = 11 : i64} {
  func.func @_fused_kernel(%arg0: i32, %arg1: memref<17x128xf32, #tpu.memory_space<vmem>>, %arg2: memref<8x128xf32, #tpu.memory_space<vmem>>, %arg3: memref<8x17xf32, #tpu.memory_space<vmem>>, %arg4: memref<16x17xf32, #tpu.memory_space<vmem>>, %arg5: memref<8x8xf32, #tpu.memory_space<vmem>>, %arg6: memref<8x128xf32, #tpu.memory_space<vmem>>, %arg7: memref<1x1x1xf32, #tpu.memory_space<vmem>>) attributes {dimension_semantics = [#tpu.dimension_semantics<parallel>], iteration_bounds = array<i64: 1>, scalar_prefetch = 0 : i64, scratch_operands = 0 : i64, tpu.core_type = #tpu.core_type<tc>, window_params = [{transform_indices = @transform_0, window_bounds = array<i64: 17, 128>}, {transform_indices = @transform_1, window_bounds = array<i64: 8, 128>}, {pipeline_mode = #tpu.pipeline_mode<synchronous>, transform_indices = @transform_2, window_bounds = array<i64: 8, 17>}, {pipeline_mode = #tpu.pipeline_mode<synchronous>, transform_indices = @transform_3, window_bounds = array<i64: 16, 17>}, {pipeline_mode = #tpu.pipeline_mode<synchronous>, transform_indices = @transform_4, window_bounds = array<i64: 8, 8>}, {transform_indices = @transform_5, window_bounds = array<i64: 8, 128>}, {transform_indices = @transform_6, window_bounds = array<i64: 1, 1, 1>}]} {
    %c0 = arith.constant 0 : index
    %c0_0 = arith.constant 0 : index
    %0 = vector.load %arg1[%c0, %c0_0] : memref<17x128xf32, #tpu.memory_space<vmem>>, vector<17x128xf32>
    %c0_1 = arith.constant 0 : index
    %c0_2 = arith.constant 0 : index
    %1 = vector.load %arg2[%c0_1, %c0_2] : memref<8x128xf32, #tpu.memory_space<vmem>>, vector<8x128xf32>
    %c0_3 = arith.constant 0 : index
    %c0_4 = arith.constant 0 : index
    %2 = vector.load %arg3[%c0_3, %c0_4] : memref<8x17xf32, #tpu.memory_space<vmem>>, vector<8x17xf32>
    %cst = arith.constant dense<0.000000e+00> : vector<8x128xf32>
    %3 = tpu.matmul %2, %0, %cst {dimension_numbers = #tpu.dot_dimension_numbers<[1], [0], [0], [1], [0, 0, 1, 1], [], []>} : vector<8x17xf32>, vector<17x128xf32>, vector<8x128xf32> -> vector<8x128xf32>
    %c0_5 = arith.constant 0 : index
    %c0_6 = arith.constant 0 : index
    %4 = vector.load %arg5[%c0_5, %c0_6] : memref<8x8xf32, #tpu.memory_space<vmem>>, vector<8x8xf32>
    %cst_7 = arith.constant dense<0.000000e+00> : vector<8x128xf32>
    %5 = tpu.matmul %4, %1, %cst_7 {dimension_numbers = #tpu.dot_dimension_numbers<[1], [0], [0], [1], [0, 0, 1, 1], [], []>} : vector<8x8xf32>, vector<8x128xf32>, vector<8x128xf32> -> vector<8x128xf32>
    %c0_8 = arith.constant 0 : index
    %c0_9 = arith.constant 0 : index
    %6 = vector.load %arg4[%c0_8, %c0_9] : memref<16x17xf32, #tpu.memory_space<vmem>>, vector<16x17xf32>
    %cst_10 = arith.constant dense<0.000000e+00> : vector<16x128xf32>
    %7 = tpu.matmul %6, %0, %cst_10 {dimension_numbers = #tpu.dot_dimension_numbers<[1], [0], [0], [1], [0, 0, 1, 1], [], []>} : vector<16x17xf32>, vector<17x128xf32>, vector<16x128xf32> -> vector<16x128xf32>
    %cst_11 = arith.constant dense<0.000000e+00> : vector<128xf32>
    %8 = vector.multi_reduction <add>, %7, %cst_11 [0] : vector<16x128xf32> to vector<128xf32>
    %9 = vector.shape_cast %8 : vector<128xf32> to vector<1x128xf32>
    %cst_12 = arith.constant 1.600000e+01 : f32
    %10 = vector.broadcast %cst_12 : f32 to vector<1x128xf32>
    %11 = arith.divf %9, %10 : vector<1x128xf32>
    %12 = vector.broadcast %11 : vector<1x128xf32> to vector<16x128xf32>
    %13 = arith.subf %7, %12 : vector<16x128xf32>
    %14 = arith.mulf %13, %13 : vector<16x128xf32>
    %cst_13 = arith.constant dense<0.000000e+00> : vector<128xf32>
    %15 = vector.multi_reduction <add>, %14, %cst_13 [0] : vector<16x128xf32> to vector<128xf32>
    %16 = vector.shape_cast %15 : vector<128xf32> to vector<1x128xf32>
    %cst_14 = arith.constant 1.600000e+01 : f32
    %17 = vector.broadcast %cst_14 : f32 to vector<1x128xf32>
    %18 = arith.divf %16, %17 : vector<1x128xf32>
    %cst_15 = arith.constant 9.99999974E-6 : f32
    %19 = vector.broadcast %cst_15 : f32 to vector<1x128xf32>
    %20 = arith.addf %18, %19 : vector<1x128xf32>
    %21 = math.sqrt %20 : vector<1x128xf32>
    %22 = vector.broadcast %21 : vector<1x128xf32> to vector<8x128xf32>
    %23 = arith.mulf %3, %22 : vector<8x128xf32>
    %24 = vector.broadcast %11 : vector<1x128xf32> to vector<8x128xf32>
    %25 = arith.addf %23, %24 : vector<8x128xf32>
    %c0_16 = arith.constant 0 : index
    %c0_17 = arith.constant 0 : index
    %26 = vector.load %arg6[%c0_16, %c0_17] : memref<8x128xf32, #tpu.memory_space<vmem>>, vector<8x128xf32>
    tpu.vector_store %arg6[%c0_16, %c0_17], %25 {strides = array<i32>} : memref<8x128xf32, #tpu.memory_space<vmem>>, vector<8x128xf32>,
    %c128_i32 = arith.constant 128 : i32
    %27 = arith.muli %arg0, %c128_i32 : i32
    %28 = tpu.iota {dimensions = array<i32: 1>} : vector<1x128xi32>
    %29 = vector.broadcast %27 : i32 to vector<1x128xi32>
    %30 = arith.addi %29, %28 : vector<1x128xi32>
    %c8_i32 = arith.constant 8 : i32
    %31 = vector.broadcast %c8_i32 : i32 to vector<1x128xi32>
    %32 = arith.cmpi slt, %30, %31 : vector<1x128xi32>
    %33 = arith.subf %25, %5 : vector<8x128xf32>
    %34 = arith.mulf %33, %33 : vector<8x128xf32>
    %cst_18 = arith.constant 0.000000e+00 : f32
    %35 = vector.shape_cast %32 : vector<1x128xi1> to vector<1x128xi1>
    %36 = vector.broadcast %35 : vector<1x128xi1> to vector<8x128xi1>
    %37 = vector.broadcast %cst_18 : f32 to vector<8x128xf32>
    %38 = arith.select %36, %34, %37 : vector<8x128xi1>, vector<8x128xf32>
    %39 = vector.shape_cast %38 : vector<8x128xf32> to vector<1x8x128xf32>
    %cst_19 = arith.constant dense<0.000000e+00> : vector<1xf32>
    %40 = vector.multi_reduction <add>, %39, %cst_19 [1, 2] : vector<1x8x128xf32> to vector<1xf32>
    %41 = vector.shape_cast %40 : vector<1xf32> to vector<1x1x1xf32>
    %42 = vector.extract %41[0, 0, 0] : f32 from vector<1x1x1xf32>
    %43 = vector.broadcast %42 : f32 to vector<1x1xf32>
    %c0_20 = arith.constant 0 : index
    %c0_21 = arith.constant 0 : index
    %c0_22 = arith.constant 0 : index
    %44 = vector.load %arg7[%c0_20, %c0_21, %c0_22] : memref<1x1x1xf32, #tpu.memory_space<vmem>>, vector<1x1x1xf32>
    %45 = vector.shape_cast %44 : vector<1x1x1xf32> to vector<1x1xf32>
    %46 = vector.shape_cast %43 : vector<1x1xf32> to vector<1x1x1xf32>
    tpu.vector_store %arg7[%c0_20, %c0_21, %c0_22], %46 {strides = array<i32>} : memref<1x1x1xf32, #tpu.memory_space<vmem>>, vector<1x1x1xf32>,
    return
  }
  func.func @transform_0(%arg0: i32) -> (i32, i32) {
    %c0_i32 = arith.constant 0 : i32
    %c0_i32_0 = arith.constant 0 : i32
    return %c0_i32, %arg0 : i32, i32
  }
  func.func @transform_1(%arg0: i32) -> (i32, i32) {
    %c0_i32 = arith.constant 0 : i32
    %c0_i32_0 = arith.constant 0 : i32
    return %c0_i32, %arg0 : i32, i32
  }
  func.func @transform_2(%arg0: i32) -> (i32, i32) {
    %c0_i32 = arith.constant 0 : i32
    %c0_i32_0 = arith.constant 0 : i32
    %c0_i32_1 = arith.constant 0 : i32
    return %c0_i32, %c0_i32_0 : i32, i32
  }
  func.func @transform_3(%arg0: i32) -> (i32, i32) {
    %c0_i32 = arith.constant 0 : i32
    %c0_i32_0 = arith.constant 0 : i32
    %c0_i32_1 = arith.constant 0 : i32
    return %c0_i32, %c0_i32_0 : i32, i32
  }
  func.func @transform_4(%arg0: i32) -> (i32, i32) {
    %c0_i32 = arith.constant 0 : i32
    %c0_i32_0 = arith.constant 0 : i32
    %c0_i32_1 = arith.constant 0 : i32
    return %c0_i32, %c0_i32_0 : i32, i32
  }
  func.func @transform_5(%arg0: i32) -> (i32, i32) {
    %c0_i32 = arith.constant 0 : i32
    %c0_i32_0 = arith.constant 0 : i32
    return %c0_i32, %arg0 : i32, i32
  }
  func.func @transform_6(%arg0: i32) -> (i32, i32, i32) {
    %c0_i32 = arith.constant 0 : i32
    %c0_i32_0 = arith.constant 0 : i32
    %c0_i32_1 = arith.constant 0 : i32
    return %arg0, %c0_i32, %c0_i32_0 : i32, i32, i32
  }
}

</mosaic_0001>

<bundles_post_ra>
// kernel: decomp_linear_forward.1
= control target key start
LH: loop header
LB: loop body
LE: loop exit
PB: predicated region body
PF: predicated region fallthrough
CT: control target
= control target key end

     0   :  { %vm107_vm0 = vcmask 64512   ;;  %v416_v3 = vmov 0.0   ;;  %vm417_vm1 = vmmov 0   ;;  %vm28_vm2 = vcmask 138240   ;;  %s497_s0 = inlined_call_operand.vmem [shape: f32[17,128], index: 0, kind: input, shape index: {}]   ;;  %s498_s1 = inlined_call_operand.vmem [shape: f32[8,128], index: 1, kind: input, shape index: {}]   ;;  %s499_s2 = inlined_call_operand.vmem [shape: f32[8,17], index: 2, kind: input, shape index: {}]   ;;  %s500_s3 = inlined_call_operand.vmem [shape: f32[16,17], index: 3, kind: input, shape index: {}]   ;;  %s501_s4 = inlined_call_operand.vmem [shape: f32[8,8], index: 4, kind: input, shape index: {}]   ;;  %s502_s5 = inlined_call_operand.vmem [shape: f32[8,128], index: 5, kind: output, shape index: {0}]   ;;  %s503_s6 = inlined_call_operand.hbm [shape: f32[1,1,1], index: 6, kind: output, shape index: {1}]  }
   0x1   :  { %v26_v0 = vld [vmem:[%s498_s1] sm:$0xff]  ;;  %363 = vmatprep.subr.mxu1 %v416_v3  ;;  %365 = vmatprep.mubr.msk.f32.mxu1 %vm417_vm1, %v416_v3  ;;  %v24_v4 = vld [vmem:[%s497_s0 + $0x8] sm:$0xff] }
   0x2   :  { %v106_v1 = vld [vmem:[%s501_s4] sm:$0xff]  ;;  %364 = vmatpush3.msra.mxu1 %v26_v0  ;;  %360 = vmatprep.mubr.msk.f32.mxu0 %vm417_vm1, %v416_v3 }
   0x3   :  { %v23_v2 = vld [vmem:[%s497_s0] sm:$0xff] }
   0x4   :  { %v181_v5 = vld [vmem:[%s500_s3] sm:$0xff]  ;;  %v378_v6 = vpack.c.bf16 %v24_v4, %v23_v2 }
   0x5   :  { %12 = vsyncpa [#allocation3], 0  ;;  %366 = vmatmul.mubr.msk.f32.vlgmr.msra.gmra.mrb[0].mxu1 %vm107_vm0, %v106_v1  ;;  %v25_v7 = vld [vmem:[%s497_s0 + $0x10] sm:$0x1]  ;;  %vm32_vm3 = vcmask 1040384   ;;  %v418_v8 = vmov 0.0|0.0   ;;  %v297_v41 = vlaneseq }
   0x6   :  { %377 = vmatprep.subr.bf16.mxu0 %v418_v8  ;;  %381 = vmatprep.subr.bf16.mxu1 %v378_v6  ;;  %v182_v9 = vld [vmem:[%s500_s3 + $0x8] sm:$0xff]  ;;  %v27_v10 = vld [vmem:[%s499_s2] sm:$0xff]  ;;  %s419_s3 = smov [#allocation2]   ;;  %vm317_vm7 = vcmask 0  }
   0x7   :  { %374 = vmatprep.mubr.msk.f32.mxu1 %vm28_vm2, %v181_v5  ;;  %383 = vmatpush3.bf16.msra.mxu1 %v378_v6  ;;  %v298_v45 = vand.u32 127, %v297_v41  ;;  %s327_s11 = sshll.u32 %s419_s3, 4  ;;  %s328_s11 = int_to_ptr.vmem [resolvable:$true] %s327_s11 }
   0x8   :  { %379 = vmatpush3.bf16.msra.mxu0 %v378_v6  ;;  %372 = vmatprep.subr.msk.mxu1 %vm32_vm3, %v25_v7  ;;  %s396_s13 = scalar_lea.vmem %s328_s11, 32  ;;  %p397_p1 = scmp.lt.s32.totalorder %s328_s11, %s328_s11 }
   0x9   :  { %358 = vmatprep.subr.mxu0 %v416_v3  ;;  %vm301_vm6 = vcmp.lt.s32.totalorder %v298_v45, 8 }
   0xb   :  { %373 = vmatpush3.msk.msra.mxu1 %vm32_vm3, %v25_v7 }
   0xc   :  { %359 = vmatpush3.msk.msra.mxu0 %vm32_vm3, %v25_v7  ;;  %375 = vmatmul.mubr.msk.f32.vlgmr.msra.gmra.mrb[2].mxu1 %vm28_vm2, %v182_v9 }
   0xd   :  { %361 = vmatmul.mubr.msk.f32.vlgmr.msra.gmra.mrb[0].mxu0 %vm28_vm2, %v27_v10 }
  0xd8   :  { %v177_v11 = vpop.f32.mrb[0].mxu1 }
  0xd9   :  { %v367_v12 = vpop.f32.mrb[1].mxu1 }
  0xdf   :  { %v376_v13 = vpop.f32.mrb[2].mxu1 }
  0xe0   :  { %v102_v14 = vpop.f32.mrb[0].mxu0  ;;  %v255_v15 = vpop.f32.mrb[3].mxu1 }
  0xe1   :  { %v362_v16 = vpop.f32.mrb[1].mxu0  ;;  %v264_v17 = vadd.f32 %v376_v13, %v255_v15 }
  0xe3   :  { %v265_v18 = vrot.slane %v264_v17, 4 }
  0xe5   :  { %v266_v19 = vadd.f32 %v265_v18, %v264_v17 }
  0xe7   :  { %v267_v20 = vrot.slane %v266_v19, 2 }
  0xe9   :  { %v268_v21 = vadd.f32 %v267_v20, %v266_v19 }
  0xeb   :  { %v269_v22 = vrot.slane %v268_v21, 1 }
  0xed   :  { %v270_v23 = vadd.f32 %v269_v22, %v268_v21 }
  0xef   :  { %v272_v24 = vmul.f32 0.0625, %v270_v23 }
  0xf1   :  { %v273_v25 = vsub.f32 %v255_v15, %v272_v24  ;;  %v274_v26 = vsub.f32 %v376_v13, %v272_v24 }
  0xf3   :  { %v275_v27 = vmul.f32 %v273_v25, %v273_v25  ;;  %v276_v28 = vmul.f32 %v274_v26, %v274_v26 }
  0xf5   :  { %v277_v29 = vadd.f32 %v276_v28, %v275_v27 }
  0xf7   :  { %v278_v30 = vrot.slane %v277_v29, 4 }
  0xf9   :  { %v279_v31 = vadd.f32 %v278_v30, %v277_v29 }
  0xfb   :  { %v280_v32 = vrot.slane %v279_v31, 2 }
  0xfd   :  { %v281_v33 = vadd.f32 %v280_v32, %v279_v31 }
  0xff   :  { %v282_v34 = vrot.slane %v281_v33, 1 }
 0x101   :  { %v283_v35 = vadd.f32 %v282_v34, %v281_v33 }
 0x103   :  { %v284_v36 = vmul.f32 0.0625, %v283_v35 }
 0x105   :  { %v285_v37 = vadd.f32 1e-05, %v284_v36 }
 0x107   :  { %390 = vrsqrt.f32 %v285_v37  ;;  %vm288_vm4 = vcmp.eq.f32.partialorder %v285_v37, inf  ;;  %v291_v40 = vand.u32 2147483648, %v285_v37  ;;  %vm290_vm5 = vcmp.eq.f32.partialorder %v285_v37, 0.0 }
 0x111   :  { %v391_v38 = vpop.eup %390 }
 0x112   :  { %v287_v39 = vmul.f32 %v391_v38, %v285_v37 }
 0x114   :  { %v289_v42 = vsel %vm288_vm4, %v285_v37, %v287_v39 }
 0x115   :  { %v292_v43 = vsel %vm290_vm5, %v291_v40, %v289_v42 }
 0x116   :  { %v293_v44 = vmul.f32 %v292_v43, %v102_v14 }
 0x118   :  { %v294_v46 = vadd.f32 %v293_v44, %v272_v24 }
 0x11a   :  { %295 = vst [vmem:[%s502_s5] sm:$0xff] %v294_v46  ;;  %v302_v47 = vsub.f32 %v294_v46, %v177_v11  ;;  %s392_s5 = scalar_lea.vmem %s328_s11, 16 }
 0x11b   :  { %p393_p0 = scmp.ne.s32.totalorder %s328_s11, %s392_s5  ;;  %p398_p2 = scmp.lt.s32.totalorder %s396_s13, %s392_s5 }
 0x11c   :  { %v303_v48 = vmul.f32 %v302_v47, %v302_v47 }
 0x11d   :  { %p399_p3 = por %p398_p2, %p397_p1 }
 0x11e   :  { %v306_v49 = vsel %vm301_vm6, %v303_v48, 0.0 }
 0x11f   :  { %307 = vadd.xlane.f32.xlu0 %v306_v49  ;;  %p400_p4 = pnand %p399_p3, %p393_p0 }
 0x1ac   :  { %v308_v50 = vpop.xlane.xlu0 %307 }
 0x1ad   :  { %v309_v51 = vrot.slane %v308_v50, 4 }
 0x1af   :  { %v310_v52 = vadd.f32 %v309_v51, %v308_v50 }
 0x1b1   :  { %v311_v53 = vrot.slane %v310_v52, 2 }
 0x1b3   :  { %v312_v54 = vadd.f32 %v311_v53, %v310_v52 }
 0x1b5   :  { %v313_v55 = vrot.slane %v312_v54, 1 }
 0x1b7   :  { %v314_v56 = vadd.f32 %v313_v55, %v312_v54 }
 0x1b9   :  { %384 = vpush %v314_v56 }
 0x1ea   :  { %s385_s12 = spop %384 }
 0x1eb   :  { %v316_v57 = vstv %s385_s12 }
 0x1ec   :  { %318 = vst.msk [vmem:[#allocation2] sm:$0x1] %vm317_vm7, %v316_v57 }
 0x1ed   :  { %403 = shalt.err (!%p400_p4)
}
 0x1ee   :  { %s404_s16 = scalar_lea.hbm %s503_s6, 16 }
 0x1ef   :  { %p405_p5 = scmp.ne.s32.totalorder %s503_s6, %s404_s16  ;;  %p408_p6 = scmp.lt.u32.totalorder %s404_s16, %s503_s6 }
 0x1f1   :  { %p410_p7 = pnand %p408_p6, %p405_p5 }
 0x1f3   :  { %413 = shalt.err (!%p410_p7)
}
 0x1f4   :  { %330 = dma.vmem_to_hbm [thread:$0]  %s328_s11, 16, %s503_s6, [#allocation3]  }
 0x1f5   :  { %414 = dma.done.wait [#allocation3], 16  }
 0x1f6   :  { %415 = vsyncadd [#allocation3], 4294967280 }
 0x1f7   :  { %336 = vsyncpa [#allocation3], 1 }

</bundles_post_ra>
